<compile_context>
chip_gen: v7x
topology: tpu7x:2x2x1
jax: 0.10.0
libtpu: 0.0.40
codegen_flags: <defaults>
</compile_context>

<pallas_src>
import functools

import jax
import jax.numpy as jnp
from jax.experimental import pallas as pl
from jax.experimental.pallas import tpu as pltpu

NUM_INPUTS = 384
IN_FEATURES = NUM_INPUTS * 2  # 768

LANE = 128


def _round_up(n, m):
    return (n + m - 1) // m * m


def _mlp_kernel(n_hidden, compute_dtype, x_ref, *refs):
    """Whole (padded) MLP for one batch tile, entirely in VMEM.

    refs = (w0, b0, ..., w_{n_hidden-1}, b_{n_hidden-1}, w_last, b_last, out_ref)
    Hidden layers: relu(h @ W + b), MXU matmul, f32 accumulation.
    Final layer (real out_features == 1): w_last(1,H) contracted against
    h(block_b,H) on its last dim -> lane-dense (1, block_b) output row.
    """
    out_ref = refs[-1]
    h = x_ref[...]                                # (block_b, F_pad) compute_dtype
    for l in range(n_hidden):
        w = refs[2 * l][...]                      # (K_pad, H_pad) compute_dtype
        b = refs[2 * l + 1][...]                  # (1, H_pad) f32, row-broadcast
        z = jnp.dot(h, w, preferred_element_type=jnp.float32) + b
        h = jnp.maximum(z, 0.0).astype(compute_dtype)
    w_last = refs[2 * n_hidden][...]              # (1, H_pad) compute_dtype
    b_last = refs[2 * n_hidden + 1][...]          # (1, 1) f32
    y = jax.lax.dot_general(                      # (1, H) . (block_b, H)^T
        w_last, h,
        dimension_numbers=(((1,), (1,)), ((), ())),
        preferred_element_type=jnp.float32)       # -> (1, block_b), lane-dense
    out_ref[...] = y + b_last


def bbnn_forward(x, params, *, block_b=512, compute_dtype=jnp.bfloat16):
    """x: (B, IN_FEATURES) float32. params: list of (W[in,out], b[out]) f32.

    Matches BBNN.forward: stacked Linear/ReLU ending in Linear(.,1), squeezed.
    """
    B, F = x.shape
    n_layers = len(params)
    n_hidden = n_layers - 1
    assert n_hidden >= 1 and params[-1][0].shape[1] == 1

    # ---- batch tiling: fixed lane-aligned tile, pad B up to a tile multiple --
    block_b = max(LANE, _round_up(block_b, LANE))
    block_b = min(block_b, _round_up(B, LANE))
    B_pad = _round_up(B, block_b)
    grid = B_pad // block_b

    # ---- pad feature/hidden dims to lane multiples; cast MXU inputs to bf16 --
    F_pad = _round_up(F, LANE)
    x_p = jnp.pad(x.astype(compute_dtype), ((0, B_pad - B), (0, F_pad - F)))

    flat_args = []
    in_specs = [pl.BlockSpec((block_b, F_pad), lambda i: (i, 0))]

    in_pad = F_pad
    for l in range(n_hidden):
        w, b = params[l]
        k, h_out = w.shape
        out_pad = _round_up(h_out, LANE)
        w_p = jnp.zeros((in_pad, out_pad), compute_dtype)
        w_p = w_p.at[:k, :h_out].set(w.astype(compute_dtype))
        b_p = jnp.zeros((1, out_pad), jnp.float32)
        b_p = b_p.at[0, :h_out].set(b.astype(jnp.float32))
        flat_args += [w_p, b_p]
        in_specs += [pl.BlockSpec(w_p.shape, lambda i: (0, 0)),
                     pl.BlockSpec(b_p.shape, lambda i: (0, 0))]
        in_pad = out_pad

    w_last, b_last = params[-1]                   # (H_last, 1), (1,)
    w_last_row = jnp.zeros((1, in_pad), compute_dtype)
    w_last_row = w_last_row.at[0, :w_last.shape[0]].set(
        w_last[:, 0].astype(compute_dtype))
    b_last_11 = b_last.astype(jnp.float32).reshape(1, 1)
    flat_args += [w_last_row, b_last_11]
    in_specs += [pl.BlockSpec(w_last_row.shape, lambda i: (0, 0)),
                 pl.BlockSpec(b_last_11.shape, lambda i: (0, 0))]

    out = pl.pallas_call(
        functools.partial(_mlp_kernel, n_hidden, compute_dtype),
        out_shape=jax.ShapeDtypeStruct((1, B_pad), jnp.float32),
        grid_spec=pltpu.PrefetchScalarGridSpec(
            num_scalar_prefetch=0,
            grid=(grid,),
            in_specs=in_specs,
            out_specs=pl.BlockSpec((1, block_b), lambda i: (0, i)),
        ),
        compiler_params=pltpu.CompilerParams(
            dimension_semantics=("parallel",)),
    )(x_p, *flat_args)

    # PyTorch `pred.squeeze()`: (B, 1) -> (B,)  (scalar when B == 1).
    return jnp.squeeze(out[0, :B])


def init_bbnn_params(key, neurons):
    """Deterministic init mimicking nn.Linear default (U(-1/sqrt(fan_in), +))."""
    dims = [IN_FEATURES] + list(neurons) + [1]
    params = []
    for i in range(len(dims) - 1):
        fan_in, fan_out = dims[i], dims[i + 1]
        key, kw, kb = jax.random.split(key, 3)
        bound = 1.0 / jnp.sqrt(jnp.float32(fan_in))
        w = jax.random.uniform(kw, (fan_in, fan_out), jnp.float32, -bound, bound)
        b = jax.random.uniform(kb, (fan_out,), jnp.float32, -bound, bound)
        params.append((w, b))
    return params


if __name__ == "__main__":
    key = jax.random.PRNGKey(0)
    key, kx = jax.random.split(key)

    # Small model: BBNN(32, 16) -> layers 768->32 (ReLU) ->16 (ReLU) ->1
    neurons = (32, 16)
    params = init_bbnn_params(key, neurons)

    B = 8
    x = jax.random.normal(kx, (B, IN_FEATURES), jnp.float32)

    pred = bbnn_forward(x, params)
    jax.block_until_ready(pred)
    assert pred.shape == (B,)

    # Reference 1: plain-JAX replica of the kernel's bf16-input / f32-accum math.
    cdt = jnp.bfloat16
    h = x.astype(cdt)
    for (w, b) in params[:-1]:
        h = jnp.dot(h, w.astype(cdt), preferred_element_type=jnp.float32) + b
        h = jnp.maximum(h, 0.0).astype(cdt)
    w_l, b_l = params[-1]
    ref_bf16 = jnp.dot(h, w_l.astype(cdt),
                       preferred_element_type=jnp.float32)[:, 0] + b_l[0]
    assert jnp.allclose(pred, ref_bf16, atol=1e-2, rtol=1e-2), (pred, ref_bf16)

    # Reference 2: the exact f32 PyTorch-equivalent math (loose tol: bf16 inputs).
    h32 = x
    for l, (w, b) in enumerate(params):
        h32 = h32 @ w + b
        if l != len(params) - 1:
            h32 = jnp.maximum(h32, 0.0)
    ref32 = jnp.squeeze(h32)
    assert jnp.allclose(pred, ref32, atol=5e-2, rtol=5e-2), (pred, ref32)

    print("KERNEL_OK")
</pallas_src>

<mosaic_0001>
module attributes {stable_mosaic.version = 11 : i64} {
  func.func @_mlp_kernel(%arg0: i32, %arg1: memref<128x768xbf16, #tpu.memory_space<vmem>>, %arg2: memref<768x128xbf16, #tpu.memory_space<vmem>>, %arg3: memref<1x128xf32, #tpu.memory_space<vmem>>, %arg4: memref<128x128xbf16, #tpu.memory_space<vmem>>, %arg5: memref<1x128xf32, #tpu.memory_space<vmem>>, %arg6: memref<1x128xbf16, #tpu.memory_space<vmem>>, %arg7: memref<1x1xf32, #tpu.memory_space<vmem>>, %arg8: memref<1x128xf32, #tpu.memory_space<vmem>>) attributes {dimension_semantics = [#tpu.dimension_semantics<parallel>], iteration_bounds = array<i64: 1>, scalar_prefetch = 0 : i64, scratch_operands = 0 : i64, tpu.core_type = #tpu.core_type<tc>, window_params = [{transform_indices = @transform_0, window_bounds = array<i64: 128, 768>}, {pipeline_mode = #tpu.pipeline_mode<synchronous>, transform_indices = @transform_1, window_bounds = array<i64: 768, 128>}, {pipeline_mode = #tpu.pipeline_mode<synchronous>, transform_indices = @transform_2, window_bounds = array<i64: 1, 128>}, {pipeline_mode = #tpu.pipeline_mode<synchronous>, transform_indices = @transform_3, window_bounds = array<i64: 128, 128>}, {pipeline_mode = #tpu.pipeline_mode<synchronous>, transform_indices = @transform_4, window_bounds = array<i64: 1, 128>}, {pipeline_mode = #tpu.pipeline_mode<synchronous>, transform_indices = @transform_5, window_bounds = array<i64: 1, 128>}, {pipeline_mode = #tpu.pipeline_mode<synchronous>, transform_indices = @transform_6, window_bounds = array<i64: 1, 1>}, {transform_indices = @transform_7, window_bounds = array<i64: 1, 128>}]} {
    %c0 = arith.constant 0 : index
    %c0_0 = arith.constant 0 : index
    %0 = vector.load %arg1[%c0, %c0_0] : memref<128x768xbf16, #tpu.memory_space<vmem>>, vector<128x768xbf16>
    %c0_1 = arith.constant 0 : index
    %c0_2 = arith.constant 0 : index
    %1 = vector.load %arg2[%c0_1, %c0_2] : memref<768x128xbf16, #tpu.memory_space<vmem>>, vector<768x128xbf16>
    %c0_3 = arith.constant 0 : index
    %c0_4 = arith.constant 0 : index
    %2 = vector.load %arg3[%c0_3, %c0_4] : memref<1x128xf32, #tpu.memory_space<vmem>>, vector<1x128xf32>
    %cst = arith.constant dense<0.000000e+00> : vector<128x128xf32>
    %3 = tpu.matmul %0, %1, %cst {dimension_numbers = #tpu.dot_dimension_numbers<[1], [0], [0], [1], [0, 0, 1, 1], [], []>} : vector<128x768xbf16>, vector<768x128xbf16>, vector<128x128xf32> -> vector<128x128xf32>
    %4 = vector.broadcast %2 : vector<1x128xf32> to vector<128x128xf32>
    %5 = arith.addf %3, %4 : vector<128x128xf32>
    %cst_5 = arith.constant 0.000000e+00 : f32
    %6 = vector.broadcast %cst_5 : f32 to vector<128x128xf32>
    %7 = arith.maximumf %5, %6 : vector<128x128xf32>
    %8 = arith.truncf %7 : vector<128x128xf32> to vector<128x128xbf16>
    %c0_6 = arith.constant 0 : index
    %c0_7 = arith.constant 0 : index
    %9 = vector.load %arg4[%c0_6, %c0_7] : memref<128x128xbf16, #tpu.memory_space<vmem>>, vector<128x128xbf16>
    %c0_8 = arith.constant 0 : index
    %c0_9 = arith.constant 0 : index
    %10 = vector.load %arg5[%c0_8, %c0_9] : memref<1x128xf32, #tpu.memory_space<vmem>>, vector<1x128xf32>
    %cst_10 = arith.constant dense<0.000000e+00> : vector<128x128xf32>
    %11 = tpu.matmul %8, %9, %cst_10 {dimension_numbers = #tpu.dot_dimension_numbers<[1], [0], [0], [1], [0, 0, 1, 1], [], []>} : vector<128x128xbf16>, vector<128x128xbf16>, vector<128x128xf32> -> vector<128x128xf32>
    %12 = vector.broadcast %10 : vector<1x128xf32> to vector<128x128xf32>
    %13 = arith.addf %11, %12 : vector<128x128xf32>
    %cst_11 = arith.constant 0.000000e+00 : f32
    %14 = vector.broadcast %cst_11 : f32 to vector<128x128xf32>
    %15 = arith.maximumf %13, %14 : vector<128x128xf32>
    %16 = arith.truncf %15 : vector<128x128xf32> to vector<128x128xbf16>
    %c0_12 = arith.constant 0 : index
    %c0_13 = arith.constant 0 : index
    %17 = vector.load %arg6[%c0_12, %c0_13] : memref<1x128xbf16, #tpu.memory_space<vmem>>, vector<1x128xbf16>
    %c0_14 = arith.constant 0 : index
    %c0_15 = arith.constant 0 : index
    %18 = vector.load %arg7[%c0_14, %c0_15] : memref<1x1xf32, #tpu.memory_space<vmem>>, vector<1x1xf32>
    %cst_16 = arith.constant dense<0.000000e+00> : vector<1x128xf32>
    %19 = tpu.matmul %17, %16, %cst_16 {dimension_numbers = #tpu.dot_dimension_numbers<[1], [1], [0], [0], [0, 0, 1, 0], [], []>} : vector<1x128xbf16>, vector<128x128xbf16>, vector<1x128xf32> -> vector<1x128xf32>
    %20 = vector.broadcast %18 : vector<1x1xf32> to vector<1x128xf32>
    %21 = arith.addf %19, %20 : vector<1x128xf32>
    %c0_17 = arith.constant 0 : index
    %c0_18 = arith.constant 0 : index
    %22 = vector.load %arg8[%c0_17, %c0_18] : memref<1x128xf32, #tpu.memory_space<vmem>>, vector<1x128xf32>
    tpu.vector_store %arg8[%c0_17, %c0_18], %21 {strides = array<i32>} : memref<1x128xf32, #tpu.memory_space<vmem>>, vector<1x128xf32>,
    return
  }
  func.func @transform_0(%arg0: i32) -> (i32, i32) {
    %c0_i32 = arith.constant 0 : i32
    %c0_i32_0 = arith.constant 0 : i32
    return %arg0, %c0_i32 : i32, i32
  }
  func.func @transform_1(%arg0: i32) -> (i32, i32) {
    %c0_i32 = arith.constant 0 : i32
    %c0_i32_0 = arith.constant 0 : i32
    %c0_i32_1 = arith.constant 0 : i32
    return %c0_i32, %c0_i32_0 : i32, i32
  }
  func.func @transform_2(%arg0: i32) -> (i32, i32) {
    %c0_i32 = arith.constant 0 : i32
    %c0_i32_0 = arith.constant 0 : i32
    %c0_i32_1 = arith.constant 0 : i32
    return %c0_i32, %c0_i32_0 : i32, i32
  }
  func.func @transform_3(%arg0: i32) -> (i32, i32) {
    %c0_i32 = arith.constant 0 : i32
    %c0_i32_0 = arith.constant 0 : i32
    %c0_i32_1 = arith.constant 0 : i32
    return %c0_i32, %c0_i32_0 : i32, i32
  }
  func.func @transform_4(%arg0: i32) -> (i32, i32) {
    %c0_i32 = arith.constant 0 : i32
    %c0_i32_0 = arith.constant 0 : i32
    %c0_i32_1 = arith.constant 0 : i32
    return %c0_i32, %c0_i32_0 : i32, i32
  }
  func.func @transform_5(%arg0: i32) -> (i32, i32) {
    %c0_i32 = arith.constant 0 : i32
    %c0_i32_0 = arith.constant 0 : i32
    %c0_i32_1 = arith.constant 0 : i32
    return %c0_i32, %c0_i32_0 : i32, i32
  }
  func.func @transform_6(%arg0: i32) -> (i32, i32) {
    %c0_i32 = arith.constant 0 : i32
    %c0_i32_0 = arith.constant 0 : i32
    %c0_i32_1 = arith.constant 0 : i32
    return %c0_i32, %c0_i32_0 : i32, i32
  }
  func.func @transform_7(%arg0: i32) -> (i32, i32) {
    %c0_i32 = arith.constant 0 : i32
    %c0_i32_0 = arith.constant 0 : i32
    return %c0_i32, %arg0 : i32, i32
  }
}

</mosaic_0001>

<bundles_post_ra>
// kernel: tpu_custom_call.1
= control target key start
LH: loop header
LB: loop body
LE: loop exit
PB: predicated region body
PF: predicated region fallthrough
CT: control target
= control target key end

     0   :  { %s2130_s0 = inlined_call_operand.hbm [shape: bf16[128,768], index: 0, kind: input, shape index: {}]   ;;  %s2131_s1 = inlined_call_operand.hbm [shape: bf16[768,128], index: 1, kind: input, shape index: {}]   ;;  %s2132_s2 = inlined_call_operand.vmem [shape: f32[1,128], index: 2, kind: input, shape index: {}]   ;;  %s2133_s3 = inlined_call_operand.hbm [shape: bf16[128,128], index: 3, kind: input, shape index: {}]   ;;  %s2134_s4 = inlined_call_operand.vmem [shape: f32[1,128], index: 4, kind: input, shape index: {}]   ;;  %s2135_s5 = inlined_call_operand.vmem [shape: bf16[1,128], index: 5, kind: input, shape index: {}]   ;;  %s2136_s6 = inlined_call_operand.<no memory space> [shape: f32[1,1], index: 6, kind: input, shape index: {}]   ;;  %s2137_s7 = inlined_call_operand.hbm [shape: f32[1,128], index: 7, kind: output, shape index: {}]  }
   0x1   :  { %v12_v0 = vstv %s2136_s6 }
   0x2   :  { %13 = vst [vmem:[#allocation2] sm:$0x1] %v12_v0 }
   0x3   :  { %14 = vsyncpa [#allocation4], 0 }
   0x4   :  { %15 = vsyncpa [#allocation7], 0 }
   0x5   :  { %16 = vsyncpa [#allocation5], 0  ;;  %s1950_s26 = smov [#allocation6]   ;;  %s1856_s30 = scalar_lea.hbm %s2131_s1, 6144 }
   0x6   :  { %s34_s27 = sshll.u32 %s1950_s26, 4  ;;  %p1857_p0 = scmp.ne.s32.totalorder %s2131_s1, %s1856_s30  ;;  %s35_s27 = int_to_ptr.vmem [resolvable:$true] %s34_s27 }
   0x7   :  { %p1860_p1 = scmp.lt.u32.totalorder %s1856_s30, %s2131_s1 }
   0x9   :  { %p1862_p2 = pnand %p1860_p1, %p1857_p0 }
   0xb   :  { %1865 = shalt.err (!%p1862_p2)
}
   0xc   :  { %s1866_s6 = scalar_lea.vmem %s35_s27, 6144  ;;  %p1871_p4 = scmp.lt.s32.totalorder %s35_s27, %s35_s27 }
   0xd   :  { %p1867_p3 = scmp.ne.s32.totalorder %s35_s27, %s1866_s6  ;;  %p1872_p5 = scmp.lt.s32.totalorder %s1866_s6, %s1866_s6 }
   0xf   :  { %p1873_p6 = por %p1872_p5, %p1871_p4 }
  0x11   :  { %p1874_p7 = pnand %p1873_p6, %p1867_p3 }
  0x13   :  { %1877 = shalt.err (!%p1874_p7)
}
  0x14   :  { %s1951_s12 = smov 64   ;;  %s1952_s13 = smov 4  }
  0x15   :  { %40 = dma.hbm_to_vmem [thread:$0]  %s2131_s1, 6144, %s35_s27, [#allocation7], %s1951_s12, %s1951_s12, %s1952_s13  }
  0x16   :  { %s1953_s16 = smov [#allocation3]   ;;  %s1878_s20 = scalar_lea.hbm %s2130_s0, 6144 }
  0x17   :  { %s22_s17 = sshll.u32 %s1953_s16, 4  ;;  %p1879_p8 = scmp.ne.s32.totalorder %s2130_s0, %s1878_s20  ;;  %s23_s17 = int_to_ptr.vmem [resolvable:$true] %s22_s17 }
  0x18   :  { %p1882_p9 = scmp.lt.u32.totalorder %s1878_s20, %s2130_s0 }
  0x1a   :  { %p1884_p10 = pnand %p1882_p9, %p1879_p8 }
  0x1c   :  { %1887 = shalt.err (!%p1884_p10)
}
  0x1d   :  { %s1888_s25 = scalar_lea.vmem %s23_s17, 6144  ;;  %p1893_p12 = scmp.lt.s32.totalorder %s23_s17, %s23_s17 }
  0x1e   :  { %p1889_p11 = scmp.ne.s32.totalorder %s23_s17, %s1888_s25  ;;  %p1894_p13 = scmp.lt.s32.totalorder %s1888_s25, %s1888_s25 }
  0x20   :  { %p1895_p0 = por %p1894_p13, %p1893_p12 }
  0x22   :  { %p1896_p1 = pnand %p1895_p0, %p1889_p11 }
  0x24   :  { %1899 = shalt.err (!%p1896_p1)
}
  0x25   :  { %s1954_s1 = smov 384   ;;  %s1955_s26 = smov 24  }
  0x26   :  { %28 = dma.hbm_to_vmem [thread:$0]  %s2130_s0, 6144, %s23_s17, [#allocation4], %s1954_s1, %s1954_s1, %s1955_s26  }
  0x27   :  { %s1956_s29 = smov [#allocation8]   ;;  %s1900_s10 = scalar_lea.hbm %s2133_s3, 1024 }
  0x28   :  { %s48_s30 = sshll.u32 %s1956_s29, 4  ;;  %p1901_p2 = scmp.ne.s32.totalorder %s2133_s3, %s1900_s10  ;;  %s49_s30 = int_to_ptr.vmem [resolvable:$true] %s48_s30 }
  0x29   :  { %p1904_p3 = scmp.lt.u32.totalorder %s1900_s10, %s2133_s3 }
  0x2b   :  { %p1906_p4 = pnand %p1904_p3, %p1901_p2 }
  0x2d   :  { %1909 = shalt.err (!%p1906_p4)
}
  0x2e   :  { %s1910_s16 = scalar_lea.vmem %s49_s30, 1024  ;;  %p1915_p6 = scmp.lt.s32.totalorder %s49_s30, %s49_s30 }
  0x2f   :  { %p1911_p5 = scmp.ne.s32.totalorder %s49_s30, %s1910_s16  ;;  %p1916_p7 = scmp.lt.s32.totalorder %s1910_s16, %s1910_s16 }
  0x31   :  { %p1917_p8 = por %p1916_p7, %p1915_p6 }
  0x33   :  { %p1918_p9 = pnand %p1917_p8, %p1911_p5 }
  0x35   :  { %1921 = shalt.err (!%p1918_p9)
}
  0x36   :  { %54 = dma.hbm_to_vmem [thread:$0]  %s2133_s3, 1024, %s49_s30, [#allocation7], %s1951_s12, %s1951_s12, %s1952_s13  }
  0x37   :  { %1944 = dma.done.wait [#allocation4], 6144  }
  0x38   :  { %1945 = vsyncadd [#allocation4], 4294961152 }
  0x39   :  { %1946 = dma.done.wait [#allocation7], 7168  }
  0x3a   :  { %1947 = vsyncadd [#allocation7], 4294960128  ;;  %v1728_v1 = vld [vmem:[#allocation6 + $0x40] sm:$0xff]   ;;  %v1730_v3 = vld [vmem:[#allocation6 + $0x48] sm:$0xff]   ;;  %vm1958_vm0 = vmmov 0   ;;  %s1960_s19 = smov [#allocation9]  }
  0x3b   :  { %v1729_v2 = vld [vmem:[#allocation6] sm:$0xff]   ;;  %1431 = vmatprep.subr.bf16.mxu0 %v1728_v1  ;;  %1700 = vmatprep.subr.bf16.mxu1 %v1728_v1  ;;  %v1731_v4 = vld [vmem:[#allocation6 + $0x8] sm:$0xff]   ;;  %v1732_v5 = vld [vmem:[#allocation6 + $0x50] sm:$0xff]   ;;  %s1315_s20 = sshll.u32 %s1960_s19, 4  ;;  %s1316_s20 = int_to_ptr.vmem [resolvable:$true] %s1315_s20 }
  0x3c   :  { %1432 = vmatpush3.bf16.msra.mxu0 %v1729_v2  ;;  %1708 = vmatpush3.bf16.msra.mxu1 %v1729_v2  ;;  %v1733_v6 = vld [vmem:[#allocation6 + $0x10] sm:$0xff]   ;;  %v1734_v7 = vld [vmem:[#allocation6 + $0x58] sm:$0xff]   ;;  %v1736_v9 = vld [vmem:[#allocation6 + $0x60] sm:$0xff]   ;;  %s1922_s21 = scalar_lea.vmem %s1316_s20, 16  ;;  %s1926_s22 = scalar_lea.vmem %s1316_s20, 32 }
  0x3d   :  { %1433 = vmatprep.subr.bf16.mxu0 %v1730_v3  ;;  %1701 = vmatprep.subr.bf16.mxu1 %v1730_v3  ;;  %v1735_v8 = vld [vmem:[#allocation6 + $0x18] sm:$0xff]   ;;  %v1737_v10 = vld [vmem:[#allocation6 + $0x20] sm:$0xff]   ;;  %v1738_v11 = vld [vmem:[#allocation6 + $0x68] sm:$0xff]   ;;  %p1923_p10 = scmp.ne.s32.totalorder %s1316_s20, %s1922_s21  ;;  %p1927_p11 = scmp.lt.s32.totalorder %s1316_s20, %s1316_s20 }
  0x3e   :  { %v1746_v12 = vld [vmem:[#allocation3 + $0x4] ss:$24 sps:$4 sm:$0xff]   ;;  %v1739_v14 = vld [vmem:[#allocation6 + $0x28] sm:$0xff]   ;;  %v1740_v15 = vld [vmem:[#allocation6 + $0x70] sm:$0xff]   ;;  %p1928_p12 = scmp.lt.s32.totalorder %s1926_s22, %s1922_s21 }
  0x3f   :  { %v1749_v13 = vld [vmem:[#allocation3 + $0xc4] ss:$24 sps:$4 sm:$0xff]   ;;  %782 = vmatprep.mubr.bf16.mxu0 %v1746_v12  ;;  %v1741_v16 = vld [vmem:[#allocation6 + $0x30] sm:$0xff]   ;;  %v1744_v19 = vld [vmem:[#allocation3] ss:$24 sps:$4 sm:$0xff]  }
  0x40   :  { %1434 = vmatpush3.bf16.msra.mxu0 %v1731_v4  ;;  %1709 = vmatpush3.bf16.msra.mxu1 %v1731_v4  ;;  %v1742_v17 = vld [vmem:[#allocation6 + $0x78] sm:$0xff]   ;;  %v1750_v21 = vld [vmem:[#allocation6 + $0xc0] sm:$0xff]   ;;  %v1754_v25 = vld [vmem:[#allocation6 + $0xc8] sm:$0xff]   ;;  %p1929_p13 = por %p1928_p12, %p1927_p11 }
  0x41   :  { %1435 = vmatprep.subr.bf16.mxu0 %v1732_v5  ;;  %1702 = vmatprep.subr.bf16.mxu1 %v1732_v5  ;;  %v1743_v18 = vld [vmem:[#allocation6 + $0x38] sm:$0xff]   ;;  %v1751_v22 = vld [vmem:[#allocation6 + $0x140] sm:$0xff]   ;;  %v1755_v26 = vld [vmem:[#allocation6 + $0x148] sm:$0xff]  }
  0x42   :  { %814 = vmatprep.mubr.bf16.mxu1 %v1749_v13  ;;  %v1747_v20 = vld [vmem:[#allocation3 + $0xc0] ss:$24 sps:$4 sm:$0xff]   ;;  %v1758_v27 = vld [vmem:[#allocation3 + $0x34] ss:$24 sps:$4 sm:$0xff]   ;;  %v1762_v32 = vld [vmem:[#allocation3 + $0x30] ss:$24 sps:$4 sm:$0xff]   ;;  %p1930_p0 = pnand %p1929_p13, %p1923_p10 }
  0x43   :  { %v1752_v23 = vld [vmem:[#allocation6 + $0x80] sm:$0xff]   ;;  %v1756_v28 = vld [vmem:[#allocation6 + $0x88] sm:$0xff]   ;;  %v1764_v31 = vld [vmem:[#allocation6 + $0xd0] sm:$0xff]  }
  0x44   :  { %1436 = vmatpush3.bf16.msra.mxu0 %v1733_v6  ;;  %1710 = vmatpush3.bf16.msra.mxu1 %v1733_v6  ;;  %v1753_v24 = vld [vmem:[#allocation6 + $0x100] sm:$0xff]   ;;  %v1760_v29 = vld [vmem:[#allocation3 + $0xf4] ss:$24 sps:$4 sm:$0xff]   ;;  %v1763_v34 = vld [vmem:[#allocation3 + $0xf0] ss:$24 sps:$4 sm:$0xff]  }
  0x45   :  { %1437 = vmatprep.subr.bf16.mxu0 %v1734_v7  ;;  %1703 = vmatprep.subr.bf16.mxu1 %v1734_v7  ;;  %v1757_v30 = vld [vmem:[#allocation6 + $0x108] sm:$0xff]   ;;  %v1765_v33 = vld [vmem:[#allocation6 + $0x150] sm:$0xff]   ;;  %v1768_v37 = vld [vmem:[#allocation6 + $0xd8] sm:$0xff]  }
  0x46   :  { %v1766_v35 = vld [vmem:[#allocation6 + $0x90] sm:$0xff]   ;;  %v1769_v38 = vld [vmem:[#allocation6 + $0x158] sm:$0xff]   ;;  %v1778_v43 = vld [vmem:[#allocation6 + $0xe0] sm:$0xff]  }
  0x47   :  { %v1767_v36 = vld [vmem:[#allocation6 + $0x110] sm:$0xff]   ;;  %v1772_v39 = vld [vmem:[#allocation3 + $0x64] ss:$24 sps:$4 sm:$0xff]   ;;  %v1776_v44 = vld [vmem:[#allocation3 + $0x60] ss:$24 sps:$4 sm:$0xff]  }
  0x48   :  { %1438 = vmatpush3.bf16.msra.mxu0 %v1735_v8  ;;  %1711 = vmatpush3.bf16.msra.mxu1 %v1735_v8  ;;  %v1770_v40 = vld [vmem:[#allocation6 + $0x98] sm:$0xff]   ;;  %v1779_v46 = vld [vmem:[#allocation6 + $0x160] sm:$0xff]   ;;  %v1782_v49 = vld [vmem:[#allocation6 + $0xe8] sm:$0xff]  }
  0x49   :  { %1439 = vmatprep.subr.bf16.mxu0 %v1736_v9  ;;  %1704 = vmatprep.subr.bf16.mxu1 %v1736_v9  ;;  %v1774_v41 = vld [vmem:[#allocation3 + $0x124] ss:$24 sps:$4 sm:$0xff]   ;;  %v1777_v45 = vld [vmem:[#allocation3 + $0x120] ss:$24 sps:$4 sm:$0xff]   ;;  %v1783_v50 = vld [vmem:[#allocation6 + $0x168] sm:$0xff]  }
  0x4a   :  { %v1771_v42 = vld [vmem:[#allocation6 + $0x118] sm:$0xff]   ;;  %v1780_v47 = vld [vmem:[#allocation6 + $0xa0] sm:$0xff]   ;;  %v1786_v51 = vld [vmem:[#allocation3 + $0x94] ss:$24 sps:$4 sm:$0xff]  }
  0x4b   :  { %v1781_v48 = vld [vmem:[#allocation6 + $0x120] sm:$0xff]   ;;  %v1788_v52 = vld [vmem:[#allocation3 + $0x154] ss:$24 sps:$4 sm:$0xff]   ;;  %v1790_v56 = vld [vmem:[#allocation3 + $0x90] ss:$24 sps:$4 sm:$0xff]  }
  0x4c   :  { %1440 = vmatpush3.bf16.msra.mxu0 %v1737_v10  ;;  %1712 = vmatpush3.bf16.msra.mxu1 %v1737_v10  ;;  %v1784_v53 = vld [vmem:[#allocation6 + $0xa8] sm:$0xff]   ;;  %v1792_v55 = vld [vmem:[#allocation6 + $0xf0] sm:$0xff]   ;;  %v1796_v61 = vld [vmem:[#allocation6 + $0xf8] sm:$0xff]  }
  0x4d   :  { %1441 = vmatprep.subr.bf16.mxu0 %v1738_v11  ;;  %1705 = vmatprep.subr.bf16.mxu1 %v1738_v11  ;;  %v1785_v54 = vld [vmem:[#allocation6 + $0x128] sm:$0xff]   ;;  %v1793_v58 = vld [vmem:[#allocation6 + $0x170] sm:$0xff]   ;;  %v1797_v62 = vld [vmem:[#allocation6 + $0x178] sm:$0xff]  }
  0x4e   :  { %v1791_v57 = vld [vmem:[#allocation3 + $0x150] ss:$24 sps:$4 sm:$0xff]   ;;  %v1798_v63 = vld [vmem:[#allocation6 + $0xb8] sm:$0xff]   ;;  %v1802_v1 = vld [vmem:[#allocation3 + $0xc] ss:$24 sps:$4 sm:$0xff]  }
  0x4f   :  { %v1794_v59 = vld [vmem:[#allocation6 + $0xb0] sm:$0xff]   ;;  %v1799_v0 = vld [vmem:[#allocation6 + $0x138] sm:$0xff]   ;;  %v1800_v2 = vld [vmem:[#allocation3 + $0x8] ss:$24 sps:$4 sm:$0xff]  }
  0x50   :  { %1442 = vmatpush3.bf16.msra.mxu0 %v1739_v14  ;;  %1713 = vmatpush3.bf16.msra.mxu1 %v1739_v14  ;;  %v1795_v60 = vld [vmem:[#allocation6 + $0x130] sm:$0xff]   ;;  %v1808_v6 = vld [vmem:[#allocation3 + $0x44] ss:$24 sps:$4 sm:$0xff]   ;;  %v1811_v8 = vld [vmem:[#allocation3 + $0x40] ss:$24 sps:$4 sm:$0xff]  }
  0x51   :  { %1443 = vmatprep.subr.bf16.mxu0 %v1740_v15  ;;  %1706 = vmatprep.subr.bf16.mxu1 %v1740_v15  ;;  %v1805_v3 = vld [vmem:[#allocation3 + $0x14] ss:$24 sps:$4 sm:$0xff]   ;;  %v1803_v4 = vld [vmem:[#allocation3 + $0x10] ss:$24 sps:$4 sm:$0xff]   ;;  %v1820_v14 = vld [vmem:[#allocation3 + $0xa4] ss:$24 sps:$4 sm:$0xff]  }
  0x52   :  { %v1806_v5 = vld [vmem:[#allocation3 + $0x3c] ss:$24 sps:$4 sm:$0xff]   ;;  %v1810_v7 = vld [vmem:[#allocation3 + $0x38] ss:$24 sps:$4 sm:$0xff]   ;;  %v1812_v9 = vld [vmem:[#allocation3 + $0x6c] ss:$24 sps:$4 sm:$0xff]  }
  0x53   :  { %v1814_v10 = vld [vmem:[#allocation3 + $0x74] ss:$24 sps:$4 sm:$0xff]   ;;  %v1816_v11 = vld [vmem:[#allocation3 + $0x68] ss:$24 sps:$4 sm:$0xff]  }
  0x54   :  { %1444 = vmatpush3.bf16.msra.mxu0 %v1741_v16  ;;  %1714 = vmatpush3.bf16.msra.mxu1 %v1741_v16  ;;  %v1817_v12 = vld [vmem:[#allocation3 + $0x70] ss:$24 sps:$4 sm:$0xff]   ;;  %v1818_v13 = vld [vmem:[#allocation3 + $0x9c] ss:$24 sps:$4 sm:$0xff]   ;;  %v1848_v15 = vld [vmem:[#allocation8] sm:$0xff]  }
  0x55   :  { %1445 = vmatprep.subr.bf16.mxu0 %v1742_v17  ;;  %1707 = vmatprep.subr.bf16.mxu1 %v1742_v17  ;;  %v1849_v16 = vld [vmem:[#allocation8 + $0x8] sm:$0xff]   ;;  %v1822_v17 = vld [vmem:[#allocation3 + $0x98] ss:$24 sps:$4 sm:$0xff]  }
  0x58   :  { %1446 = vmatpush3.bf16.msra.mxu0 %v1743_v18  ;;  %1715 = vmatpush3.bf16.msra.mxu1 %v1743_v18  ;;  %v1823_v18 = vld [vmem:[#allocation3 + $0xa0] ss:$24 sps:$4 sm:$0xff]  }
  0x59   :  { %1495 = vmatprep.subr.bf16.mxu1 %v1750_v21  ;;  %1559 = vmatprep.subr.bf16.mxu0 %v1751_v22  ;;  %v1828_v21 = vld [vmem:[#allocation3 + $0xc8] ss:$24 sps:$4 sm:$0xff]  }
  0x5a   :  { %v1829_v22 = vld [vmem:[#allocation3 + $0xd0] ss:$24 sps:$4 sm:$0xff]  }
  0x5b   :  { %783 = vmatmul.mubr.bf16.vlgmr.msra.gmra.mrb[0].mxu0 %v1744_v19  ;;  %815 = vmatmul.mubr.bf16.vlgmr.msra.gmra.mrb[0].mxu1 %v1747_v20  ;;  %v1824_v19 = vld [vmem:[#allocation3 + $0xcc] ss:$24 sps:$4 sm:$0xff]  }
  0x5c   :  { %1496 = vmatpush3.bf16.msra.mxu1 %v1752_v23  ;;  %1560 = vmatpush3.bf16.msra.mxu0 %v1753_v24  ;;  %v1826_v20 = vld [vmem:[#allocation3 + $0xd4] ss:$24 sps:$4 sm:$0xff]   ;;  %v1832_v24 = vld [vmem:[#allocation3 + $0x104] ss:$24 sps:$4 sm:$0xff]  }
  0x5d   :  { %1497 = vmatprep.subr.bf16.mxu1 %v1754_v25  ;;  %1561 = vmatprep.subr.bf16.mxu0 %v1755_v26  ;;  %v1830_v23 = vld [vmem:[#allocation3 + $0xfc] ss:$24 sps:$4 sm:$0xff]   ;;  %v1834_v25 = vld [vmem:[#allocation3 + $0xf8] ss:$24 sps:$4 sm:$0xff]  }
  0x5e   :  { %790 = vmatprep.mubr.bf16.mxu0 %v1758_v27  ;;  %822 = vmatprep.mubr.bf16.mxu1 %v1760_v29  ;;  %v1835_v26 = vld [vmem:[#allocation3 + $0x100] ss:$24 sps:$4 sm:$0xff]   ;;  %v1836_v27 = vld [vmem:[#allocation3 + $0x12c] ss:$24 sps:$4 sm:$0xff]  }
  0x5f   :  { %v1840_v29 = vld [vmem:[#allocation3 + $0x128] ss:$24 sps:$4 sm:$0xff]  }
  0x60   :  { %1498 = vmatpush3.bf16.msra.mxu1 %v1756_v28  ;;  %1562 = vmatpush3.bf16.msra.mxu0 %v1757_v30  ;;  %v1838_v28 = vld [vmem:[#allocation3 + $0x134] ss:$24 sps:$4 sm:$0xff]   ;;  %v1841_v30 = vld [vmem:[#allocation3 + $0x130] ss:$24 sps:$4 sm:$0xff]  }
  0x61   :  { %1499 = vmatprep.subr.bf16.mxu1 %v1764_v31  ;;  %1563 = vmatprep.subr.bf16.mxu0 %v1765_v33  ;;  %v1842_v31 = vld [vmem:[#allocation3 + $0x15c] ss:$24 sps:$4 sm:$0xff]   ;;  %v1846_v33 = vld [vmem:[#allocation3 + $0x158] ss:$24 sps:$4 sm:$0xff]  }
  0x63   :  { %791 = vmatmul.mubr.bf16.gmra.mrb[4].mxu0 %v1762_v32  ;;  %823 = vmatmul.mubr.bf16.gmra.mrb[4].mxu1 %v1763_v34  ;;  %v1844_v32 = vld [vmem:[#allocation3 + $0x164] ss:$24 sps:$4 sm:$0xff]   ;;  %v1847_v34 = vld [vmem:[#allocation3 + $0x160] ss:$24 sps:$4 sm:$0xff]  }
  0x64   :  { %1500 = vmatpush3.bf16.msra.mxu1 %v1766_v35  ;;  %1564 = vmatpush3.bf16.msra.mxu0 %v1767_v36  ;;  %v1850_v35 = vld [vmem:[#allocation8 + $0x10] sm:$0xff]   ;;  %v1851_v36 = vld [vmem:[#allocation8 + $0x18] sm:$0xff]  }
  0x65   :  { %1501 = vmatprep.subr.bf16.mxu1 %v1768_v37  ;;  %1565 = vmatprep.subr.bf16.mxu0 %v1769_v38  ;;  %v1852_v37 = vld [vmem:[#allocation8 + $0x20] sm:$0xff]   ;;  %v1853_v38 = vld [vmem:[#allocation8 + $0x28] sm:$0xff]  }
  0x66   :  { %798 = vmatprep.mubr.bf16.mxu0 %v1772_v39  ;;  %830 = vmatprep.mubr.bf16.mxu1 %v1774_v41  ;;  %v1854_v39 = vld [vmem:[#allocation8 + $0x30] sm:$0xff]  }
  0x68   :  { %1502 = vmatpush3.bf16.msra.mxu1 %v1770_v40  ;;  %1566 = vmatpush3.bf16.msra.mxu0 %v1771_v42  ;;  %v1855_v40 = vld [vmem:[#allocation8 + $0x38] sm:$0xff]  }
  0x69   :  { %1503 = vmatprep.subr.bf16.mxu1 %v1778_v43  ;;  %1567 = vmatprep.subr.bf16.mxu0 %v1779_v46 }
  0x6b   :  { %799 = vmatmul.mubr.bf16.gmra.mrb[8].mxu0 %v1776_v44  ;;  %831 = vmatmul.mubr.bf16.gmra.mrb[8].mxu1 %v1777_v45 }
  0x6c   :  { %1504 = vmatpush3.bf16.msra.mxu1 %v1780_v47  ;;  %1568 = vmatpush3.bf16.msra.mxu0 %v1781_v48 }
  0x6d   :  { %1505 = vmatprep.subr.bf16.mxu1 %v1782_v49  ;;  %1569 = vmatprep.subr.bf16.mxu0 %v1783_v50 }
  0x6e   :  { %806 = vmatprep.mubr.bf16.mxu0 %v1786_v51  ;;  %838 = vmatprep.mubr.bf16.mxu1 %v1788_v52 }
  0x70   :  { %1506 = vmatpush3.bf16.msra.mxu1 %v1784_v53  ;;  %1570 = vmatpush3.bf16.msra.mxu0 %v1785_v54 }
  0x71   :  { %1507 = vmatprep.subr.bf16.mxu1 %v1792_v55  ;;  %1571 = vmatprep.subr.bf16.mxu0 %v1793_v58 }
  0x73   :  { %807 = vmatmul.mubr.bf16.gmra.mrb[12].mxu0 %v1790_v56  ;;  %839 = vmatmul.mubr.bf16.gmra.mrb[12].mxu1 %v1791_v57 }
  0x74   :  { %1508 = vmatpush3.bf16.msra.mxu1 %v1794_v59  ;;  %1572 = vmatpush3.bf16.msra.mxu0 %v1795_v60 }
  0x75   :  { %1509 = vmatprep.subr.bf16.mxu1 %v1796_v61  ;;  %1573 = vmatprep.subr.bf16.mxu0 %v1797_v62 }
  0x76   :  { %879 = vmatprep.mubr.bf16.mxu1 %v1802_v1  ;;  %976 = vmatprep.mubr.bf16.mxu0 %v1805_v3 }
  0x78   :  { %1510 = vmatpush3.bf16.msra.mxu1 %v1798_v63  ;;  %1574 = vmatpush3.bf16.msra.mxu0 %v1799_v0 }
  0x79   :  { %1648 = vmatprep.subr.bf16.mxu1 %v1848_v15 }
  0x7b   :  { %880 = vmatmul.mubr.bf16.vlgmr.msra.gmra.mrb[16].mxu1 %v1800_v2  ;;  %977 = vmatmul.mubr.bf16.vlgmr.msra.gmra.mrb[16].mxu0 %v1803_v4 }
  0x7c   :  { %887 = vmatprep.mubr.bf16.mxu1 %v1806_v5  ;;  %984 = vmatprep.mubr.bf16.mxu0 %v1808_v6 }
  0x7d   :  { %1649 = vmatpush3.bf16.msra.mxu1 %v1848_v15 }
  0x7e   :  { %1650 = vmatprep.subr.bf16.mxu1 %v1849_v16 }
  0x81   :  { %1651 = vmatpush3.bf16.msra.mxu1 %v1849_v16 }
  0x82   :  { %1652 = vmatprep.subr.bf16.mxu1 %v1850_v35 }
  0x83   :  { %888 = vmatmul.mubr.bf16.gmra.mrb[20].mxu1 %v1810_v7  ;;  %985 = vmatmul.mubr.bf16.gmra.mrb[20].mxu0 %v1811_v8 }
  0x84   :  { %895 = vmatprep.mubr.bf16.mxu1 %v1812_v9  ;;  %992 = vmatprep.mubr.bf16.mxu0 %v1814_v10 }
  0x85   :  { %1653 = vmatpush3.bf16.msra.mxu1 %v1850_v35 }
  0x86   :  { %1654 = vmatprep.subr.bf16.mxu1 %v1851_v36 }
  0x89   :  { %1655 = vmatpush3.bf16.msra.mxu1 %v1851_v36 }
  0x8a   :  { %1656 = vmatprep.subr.bf16.mxu1 %v1852_v37 }
  0x8b   :  { %896 = vmatmul.mubr.bf16.gmra.mrb[24].mxu1 %v1816_v11  ;;  %993 = vmatmul.mubr.bf16.gmra.mrb[24].mxu0 %v1817_v12 }
  0x8c   :  { %903 = vmatprep.mubr.bf16.mxu1 %v1818_v13  ;;  %1000 = vmatprep.mubr.bf16.mxu0 %v1820_v14 }
  0x8d   :  { %1657 = vmatpush3.bf16.msra.mxu1 %v1852_v37 }
  0x8e   :  { %1658 = vmatprep.subr.bf16.mxu1 %v1853_v38 }
  0x91   :  { %1659 = vmatpush3.bf16.msra.mxu1 %v1853_v38 }
  0x92   :  { %1660 = vmatprep.subr.bf16.mxu1 %v1854_v39 }
  0x93   :  { %904 = vmatmul.mubr.bf16.gmra.mrb[28].mxu1 %v1822_v17  ;;  %1001 = vmatmul.mubr.bf16.gmra.mrb[28].mxu0 %v1823_v18 }
  0x94   :  { %911 = vmatprep.mubr.bf16.mxu1 %v1824_v19  ;;  %1008 = vmatprep.mubr.bf16.mxu0 %v1826_v20 }
  0x95   :  { %1661 = vmatpush3.bf16.msra.mxu1 %v1854_v39 }
  0x96   :  { %1662 = vmatprep.subr.bf16.mxu1 %v1855_v40 }
  0x99   :  { %1663 = vmatpush3.bf16.msra.mxu1 %v1855_v40 }
  0x9b   :  { %912 = vmatmul.mubr.bf16.gmra.mrb[32].mxu1 %v1828_v21  ;;  %1009 = vmatmul.mubr.bf16.gmra.mrb[32].mxu0 %v1829_v22 }
  0x9c   :  { %919 = vmatprep.mubr.bf16.mxu1 %v1830_v23  ;;  %1016 = vmatprep.mubr.bf16.mxu0 %v1832_v24 }
  0xa3   :  { %920 = vmatmul.mubr.bf16.gmra.mrb[36].mxu1 %v1834_v25  ;;  %1017 = vmatmul.mubr.bf16.gmra.mrb[36].mxu0 %v1835_v26  ;;  %v2073_v25 = vld [vmem:[%s2132_s2] ss:$0 sm:$0xff] }
  0xa4   :  { %927 = vmatprep.mubr.bf16.mxu1 %v1836_v27  ;;  %1024 = vmatprep.mubr.bf16.mxu0 %v1838_v28 }
  0xab   :  { %928 = vmatmul.mubr.bf16.gmra.mrb[40].mxu1 %v1840_v29  ;;  %1025 = vmatmul.mubr.bf16.gmra.mrb[40].mxu0 %v1841_v30 }
  0xac   :  { %935 = vmatprep.mubr.bf16.mxu1 %v1842_v31  ;;  %1032 = vmatprep.mubr.bf16.mxu0 %v1844_v32 }
  0xb3   :  { %936 = vmatmul.mubr.bf16.gmra.mrb[44].mxu1 %v1846_v33  ;;  %1033 = vmatmul.mubr.bf16.gmra.mrb[44].mxu0 %v1847_v34 }
 0x12e   :  { %v1447_v41 = vpop.f32.mrb[0].mxu0  ;;  %v1471_v42 = vpop.f32.mrb[0].mxu1 }
 0x12f   :  { %v1448_v43 = vpop.f32.mrb[1].mxu0  ;;  %v1472_v44 = vpop.f32.mrb[1].mxu1 }
 0x130   :  { %v1449_v45 = vadd.f32 %v1448_v43, %v1447_v41  ;;  %v2046_v46 = vadd.f32 %v1472_v44, %v1471_v42  ;;  %v1450_v47 = vpop.f32.mrb[2].mxu0  ;;  %v1474_v48 = vpop.f32.mrb[2].mxu1 }
 0x131   :  { %v1451_v49 = vpop.f32.mrb[3].mxu0  ;;  %v1475_v50 = vpop.f32.mrb[3].mxu1 }
 0x132   :  { %v1452_v51 = vadd.f32 %v1451_v49, %v1450_v47  ;;  %v2048_v52 = vadd.f32 %v1475_v50, %v1474_v48  ;;  %v785_v30 = vadd.f32 %v1449_v45, %v2073_v25 }
 0x134   :  { %v788_v37 = vadd.f32 %v1452_v51, %v2073_v25 }
 0x136   :  { %v1453_v53 = vpop.f32.mrb[4].mxu0  ;;  %v1477_v54 = vpop.f32.mrb[4].mxu1 }
 0x137   :  { %v1454_v55 = vpop.f32.mrb[5].mxu0  ;;  %v1478_v56 = vpop.f32.mrb[5].mxu1 }
 0x138   :  { %v1455_v57 = vadd.f32 %v1454_v55, %v1453_v53  ;;  %v2050_v58 = vadd.f32 %v1478_v56, %v1477_v54  ;;  %v1456_v59 = vpop.f32.mrb[6].mxu0  ;;  %v1480_v60 = vpop.f32.mrb[6].mxu1 }
 0x139   :  { %v1457_v61 = vpop.f32.mrb[7].mxu0  ;;  %v1481_v62 = vpop.f32.mrb[7].mxu1 }
 0x13a   :  { %v1458_v63 = vadd.f32 %v1457_v61, %v1456_v59  ;;  %v2052_v0 = vadd.f32 %v1481_v62, %v1480_v60  ;;  %v793_v48 = vadd.f32 %v1455_v57, %v2073_v25 }
 0x13c   :  { %v796_v51 = vadd.f32 %v1458_v63, %v2073_v25 }
 0x13e   :  { %v1459_v1 = vpop.f32.mrb[8].mxu0  ;;  %v1483_v2 = vpop.f32.mrb[8].mxu1 }
 0x13f   :  { %v1460_v3 = vpop.f32.mrb[9].mxu0  ;;  %v1484_v4 = vpop.f32.mrb[9].mxu1 }
 0x140   :  { %v2054_v5 = vadd.f32 %v1460_v3, %v1459_v1  ;;  %v2056_v6 = vadd.f32 %v1484_v4, %v1483_v2  ;;  %v1462_v7 = vpop.f32.mrb[10].mxu0  ;;  %v1486_v8 = vpop.f32.mrb[10].mxu1 }
 0x141   :  { %v1463_v9 = vpop.f32.mrb[11].mxu0  ;;  %v1487_v10 = vpop.f32.mrb[11].mxu1 }
 0x142   :  { %v2058_v11 = vadd.f32 %v1463_v9, %v1462_v7  ;;  %v2060_v12 = vadd.f32 %v1487_v10, %v1486_v8  ;;  %v801_v10 = vadd.f32 %v2054_v5, %v2073_v25 }
 0x146   :  { %v1465_v13 = vpop.f32.mrb[12].mxu0  ;;  %v1489_v14 = vpop.f32.mrb[12].mxu1 }
 0x147   :  { %v1466_v15 = vpop.f32.mrb[13].mxu0  ;;  %v1490_v16 = vpop.f32.mrb[13].mxu1 }
 0x148   :  { %v2062_v17 = vadd.f32 %v1466_v15, %v1465_v13  ;;  %v2064_v18 = vadd.f32 %v1490_v16, %v1489_v14  ;;  %v1468_v19 = vpop.f32.mrb[14].mxu0  ;;  %v1492_v20 = vpop.f32.mrb[14].mxu1 }
 0x149   :  { %v1469_v21 = vpop.f32.mrb[15].mxu0  ;;  %v1493_v22 = vpop.f32.mrb[15].mxu1 }
 0x14a   :  { %v2066_v23 = vadd.f32 %v1469_v21, %v1468_v19  ;;  %v2068_v24 = vadd.f32 %v1493_v22, %v1492_v20  ;;  %v804_v22 = vadd.f32 %v2058_v11, %v2073_v25 }
 0x14e   :  { %v1511_v26 = vpop.f32.mrb[16].mxu1  ;;  %v1575_v27 = vpop.f32.mrb[16].mxu0 }
 0x14f   :  { %v1512_v28 = vpop.f32.mrb[17].mxu1  ;;  %v1576_v29 = vpop.f32.mrb[17].mxu0 }
 0x150   :  { %v1513_v31 = vadd.f32 %v1512_v28, %v1511_v26  ;;  %v1577_v32 = vadd.f32 %v1576_v29, %v1575_v27  ;;  %v1514_v33 = vpop.f32.mrb[18].mxu1  ;;  %v1578_v34 = vpop.f32.mrb[18].mxu0 }
 0x151   :  { %v1515_v35 = vpop.f32.mrb[19].mxu1  ;;  %v1579_v36 = vpop.f32.mrb[19].mxu0 }
 0x152   :  { %v882_v38 = vadd.f32 %v1513_v31, %v785_v30  ;;  %v1516_v39 = vadd.f32 %v1515_v35, %v1514_v33  ;;  %v1580_v40 = vadd.f32 %v1579_v36, %v1578_v34  ;;  %v809_v36 = vadd.f32 %v2062_v17, %v2073_v25 }
 0x154   :  { %v979_v41 = vadd.f32 %v1577_v32, %v882_v38  ;;  %v885_v42 = vadd.f32 %v1516_v39, %v788_v37 }
 0x156   :  { %v982_v43 = vadd.f32 %v1580_v40, %v885_v42  ;;  %v1517_v44 = vpop.f32.mrb[20].mxu1  ;;  %v1581_v47 = vpop.f32.mrb[20].mxu0  ;;  %v1041_v50 = vmax.f32 %v979_v41, 0.0 }
 0x157   :  { %v1518_v49 = vpop.f32.mrb[21].mxu1  ;;  %v1582_v45 = vpop.f32.mrb[21].mxu0 }
 0x158   :  { %v1042_v53 = vmax.f32 %v982_v43, 0.0  ;;  %v1519_v54 = vadd.f32 %v1518_v49, %v1517_v44  ;;  %v1583_v55 = vadd.f32 %v1582_v45, %v1581_v47  ;;  %v1520_v56 = vpop.f32.mrb[22].mxu1  ;;  %v1584_v59 = vpop.f32.mrb[22].mxu0  ;;  %v812_v44 = vadd.f32 %v2066_v23, %v2073_v25 }
 0x159   :  { %v1521_v60 = vpop.f32.mrb[23].mxu1  ;;  %v1585_v61 = vpop.f32.mrb[23].mxu0 }
 0x15a   :  { %v890_v62 = vadd.f32 %v1519_v54, %v793_v48  ;;  %v1522_v1 = vadd.f32 %v1521_v60, %v1520_v56  ;;  %v1586_v2 = vadd.f32 %v1585_v61, %v1584_v59  ;;  %v1057_v3 = vpack.c.bf16 %v1042_v53, %v1041_v50 }
 0x15c   :  { %v987_v4 = vadd.f32 %v1583_v55, %v890_v62  ;;  %v893_v7 = vadd.f32 %v1522_v1, %v796_v51  ;;  %1664 = vmatprep.mubr.bf16.mxu1 %v1057_v3  ;;  %v817_v51 = vadd.f32 %v2046_v46, %v2073_v25 }
 0x15e   :  { %v990_v57 = vadd.f32 %v1586_v2, %v893_v7  ;;  %v1523_v8 = vpop.f32.mrb[24].mxu1  ;;  %v1587_v9 = vpop.f32.mrb[24].mxu0  ;;  %v1043_v15 = vmax.f32 %v987_v4, 0.0  ;;  %v820_v7 = vadd.f32 %v2048_v52, %v2073_v25 }
 0x15f   :  { %v1524_v13 = vpop.f32.mrb[25].mxu1  ;;  %v1588_v14 = vpop.f32.mrb[25].mxu0 }
 0x160   :  { %v1044_v16 = vmax.f32 %v990_v57, 0.0  ;;  %v1525_v63 = vadd.f32 %v1524_v13, %v1523_v8  ;;  %v1589_v19 = vadd.f32 %v1588_v14, %v1587_v9  ;;  %v1526_v20 = vpop.f32.mrb[26].mxu1  ;;  %v1590_v21 = vpop.f32.mrb[26].mxu0 }
 0x161   :  { %v1527_v26 = vpop.f32.mrb[27].mxu1  ;;  %v1591_v27 = vpop.f32.mrb[27].mxu0 }
 0x162   :  { %v1058_v28 = vpack.c.bf16 %v1044_v16, %v1043_v15  ;;  %v898_v29 = vadd.f32 %v1525_v63, %v801_v10  ;;  %v1528_v30 = vadd.f32 %v1527_v26, %v1526_v20  ;;  %v1592_v31 = vadd.f32 %v1591_v27, %v1590_v21 }
 0x163   :  { %v825_v20 = vadd.f32 %v2050_v58, %v2073_v25 }
 0x164   :  { %v995_v32 = vadd.f32 %v1589_v19, %v898_v29  ;;  %v901_v33 = vadd.f32 %v1528_v30, %v804_v22  ;;  %1665 = vmatmul.mubr.bf16.vlgmr.msra.gmra.mrb[48].mxu1 %v1058_v28 }
 0x166   :  { %v998_v5 = vadd.f32 %v1592_v31, %v901_v33  ;;  %v1529_v34 = vpop.f32.mrb[28].mxu1  ;;  %v1593_v35 = vpop.f32.mrb[28].mxu0  ;;  %v1045_v39 = vmax.f32 %v995_v32, 0.0  ;;  %v828_v31 = vadd.f32 %v2052_v0, %v2073_v25 }
 0x167   :  { %v1530_v37 = vpop.f32.mrb[29].mxu1  ;;  %v1594_v38 = vpop.f32.mrb[29].mxu0 }
 0x168   :  { %v1046_v40 = vmax.f32 %v998_v5, 0.0  ;;  %v1531_v11 = vadd.f32 %v1530_v37, %v1529_v34  ;;  %v1595_v41 = vadd.f32 %v1594_v38, %v1593_v35  ;;  %v1532_v42 = vpop.f32.mrb[30].mxu1  ;;  %v1596_v43 = vpop.f32.mrb[30].mxu0 }
 0x169   :  { %v1533_v47 = vpop.f32.mrb[31].mxu1  ;;  %v1597_v48 = vpop.f32.mrb[31].mxu0 }
 0x16a   :  { %v906_v49 = vadd.f32 %v1531_v11, %v809_v36  ;;  %v1534_v45 = vadd.f32 %v1533_v47, %v1532_v42  ;;  %v1598_v50 = vadd.f32 %v1597_v48, %v1596_v43  ;;  %v1059_v53 = vpack.c.bf16 %v1046_v40, %v1045_v39 }
 0x16b   :  { %v833_v11 = vadd.f32 %v2056_v6, %v2073_v25 }
 0x16c   :  { %v1003_v54 = vadd.f32 %v1595_v41, %v906_v49  ;;  %v909_v55 = vadd.f32 %v1534_v45, %v812_v44  ;;  %1668 = vmatprep.mubr.bf16.mxu1 %v1059_v53  ;;  %v836_v45 = vadd.f32 %v2060_v12, %v2073_v25 }
 0x16e   :  { %v1006_v17 = vadd.f32 %v1598_v50, %v909_v55  ;;  %v1535_v56 = vpop.f32.mrb[32].mxu1  ;;  %v1599_v59 = vpop.f32.mrb[32].mxu0  ;;  %v1047_v62 = vmax.f32 %v1003_v54, 0.0 }
 0x16f   :  { %v1536_v60 = vpop.f32.mrb[33].mxu1  ;;  %v1600_v61 = vpop.f32.mrb[33].mxu0 }
 0x170   :  { %v1048_v1 = vmax.f32 %v1006_v17, 0.0  ;;  %v1537_v23 = vadd.f32 %v1536_v60, %v1535_v56  ;;  %v1601_v2 = vadd.f32 %v1600_v61, %v1599_v59  ;;  %v1538_v3 = vpop.f32.mrb[34].mxu1  ;;  %v1602_v4 = vpop.f32.mrb[34].mxu0 }
 0x171   :  { %v1539_v57 = vpop.f32.mrb[35].mxu1  ;;  %v1603_v8 = vpop.f32.mrb[35].mxu0 }
 0x172   :  { %v914_v9 = vadd.f32 %v1537_v23, %v817_v51  ;;  %v1540_v10 = vadd.f32 %v1539_v57, %v1538_v3  ;;  %v1604_v13 = vadd.f32 %v1603_v8, %v1602_v4  ;;  %v1060_v14 = vpack.c.bf16 %v1048_v1, %v1047_v62 }
 0x173   :  { %v841_v62 = vadd.f32 %v2064_v18, %v2073_v25  ;;  %v844_v8 = vadd.f32 %v2068_v24, %v2073_v25  ;;  %v1258_v24 = vld [vmem:[#allocation2] sm:$0x1]  ;;  %v1959_v25 = vmov 0  }
 0x174   :  { %v1011_v15 = vadd.f32 %v1601_v2, %v914_v9  ;;  %v917_v16 = vadd.f32 %v1540_v10, %v820_v7  ;;  %1669 = vmatmul.mubr.bf16.gmra.mrb[52].mxu1 %v1060_v14  ;;  %1727 = vset.pattern.permute.xlu0 %v1959_v25 }
 0x175   :  { %1261 = vperm.xlu0 %1727, %v1258_v24  }
 0x176   :  { %v1014_v46 = vadd.f32 %v1604_v13, %v917_v16  ;;  %v1541_v63 = vpop.f32.mrb[36].mxu1  ;;  %v1605_v19 = vpop.f32.mrb[36].mxu0  ;;  %v1049_v26 = vmax.f32 %v1011_v15, 0.0 }
 0x177   :  { %v1542_v21 = vpop.f32.mrb[37].mxu1  ;;  %v1606_v22 = vpop.f32.mrb[37].mxu0 }
 0x178   :  { %v1050_v27 = vmax.f32 %v1014_v46, 0.0  ;;  %v1543_v52 = vadd.f32 %v1542_v21, %v1541_v63  ;;  %v1607_v28 = vadd.f32 %v1606_v22, %v1605_v19  ;;  %v1544_v29 = vpop.f32.mrb[38].mxu1  ;;  %v1608_v30 = vpop.f32.mrb[38].mxu0  ;;  %v1957_v22 = vmov 0.0  }
 0x179   :  { %v1545_v32 = vpop.f32.mrb[39].mxu1  ;;  %v1609_v33 = vpop.f32.mrb[39].mxu0  ;;  %1680 = vmatprep.subr.bf16.mxu0 %v1957_v22  ;;  %1696 = vmatprep.mubr.msk.bf16.mxu0 %vm1958_vm0, %v1957_v22 }
 0x17a   :  { %v922_v5 = vadd.f32 %v1543_v52, %v825_v20  ;;  %v1546_v34 = vadd.f32 %v1545_v32, %v1544_v29  ;;  %v1610_v35 = vadd.f32 %v1609_v33, %v1608_v30  ;;  %v1061_v36 = vpack.c.bf16 %v1050_v27, %v1049_v26  ;;  %v1422_v26 = vld [vmem:[%s2134_s4] ss:$0 sm:$0xff] }
 0x17c   :  { %v1019_v37 = vadd.f32 %v1607_v28, %v922_v5  ;;  %v925_v38 = vadd.f32 %v1546_v34, %v828_v31  ;;  %1672 = vmatprep.mubr.bf16.mxu1 %v1061_v36 }
 0x17e   :  { %v1022_v58 = vadd.f32 %v1610_v35, %v925_v38  ;;  %v1547_v39 = vpop.f32.mrb[40].mxu1  ;;  %v1611_v40 = vpop.f32.mrb[40].mxu0  ;;  %v1051_v43 = vmax.f32 %v1019_v37, 0.0 }
 0x17f   :  { %v1548_v41 = vpop.f32.mrb[41].mxu1  ;;  %v1612_v42 = vpop.f32.mrb[41].mxu0 }
 0x180   :  { %v1052_v44 = vmax.f32 %v1022_v58, 0.0  ;;  %v1549_v0 = vadd.f32 %v1548_v41, %v1547_v39  ;;  %v1613_v47 = vadd.f32 %v1612_v42, %v1611_v40  ;;  %v1550_v48 = vpop.f32.mrb[42].mxu1  ;;  %v1614_v49 = vpop.f32.mrb[42].mxu0 }
 0x181   :  { %v1551_v50 = vpop.f32.mrb[43].mxu1  ;;  %v1615_v53 = vpop.f32.mrb[43].mxu0 }
 0x182   :  { %v930_v54 = vadd.f32 %v1549_v0, %v833_v11  ;;  %v1552_v55 = vadd.f32 %v1551_v50, %v1550_v48  ;;  %v1616_v17 = vadd.f32 %v1615_v53, %v1614_v49  ;;  %v1062_v56 = vpack.c.bf16 %v1052_v44, %v1051_v43 }
 0x184   :  { %v1027_v59 = vadd.f32 %v1613_v47, %v930_v54  ;;  %v933_v51 = vadd.f32 %v1552_v55, %v836_v45  ;;  %1673 = vmatmul.mubr.bf16.gmra.mrb[56].mxu1 %v1062_v56 }
 0x186   :  { %v1030_v6 = vadd.f32 %v1616_v17, %v933_v51  ;;  %v1553_v60 = vpop.f32.mrb[44].mxu1  ;;  %v1617_v61 = vpop.f32.mrb[44].mxu0  ;;  %v1053_v2 = vmax.f32 %v1027_v59, 0.0 }
 0x187   :  { %v1554_v1 = vpop.f32.mrb[45].mxu1  ;;  %v1618_v23 = vpop.f32.mrb[45].mxu0 }
 0x188   :  { %v1054_v3 = vmax.f32 %v1030_v6, 0.0  ;;  %v1555_v12 = vadd.f32 %v1554_v1, %v1553_v60  ;;  %v1619_v4 = vadd.f32 %v1618_v23, %v1617_v61  ;;  %v1556_v7 = vpop.f32.mrb[46].mxu1  ;;  %v1620_v57 = vpop.f32.mrb[46].mxu0 }
 0x189   :  { %v1557_v9 = vpop.f32.mrb[47].mxu1  ;;  %v1621_v10 = vpop.f32.mrb[47].mxu0 }
 0x18a   :  { %v938_v13 = vadd.f32 %v1555_v12, %v841_v62  ;;  %v1558_v14 = vadd.f32 %v1557_v9, %v1556_v7  ;;  %v1622_v15 = vadd.f32 %v1621_v10, %v1620_v57  ;;  %v1063_v16 = vpack.c.bf16 %v1054_v3, %v1053_v2 }
 0x18c   :  { %v1035_v46 = vadd.f32 %v1619_v4, %v938_v13  ;;  %v941_v63 = vadd.f32 %v1558_v14, %v844_v8  ;;  %1676 = vmatprep.mubr.bf16.mxu1 %v1063_v16 }
 0x18e   :  { %v1038_v18 = vadd.f32 %v1622_v15, %v941_v63  ;;  %v1055_v19 = vmax.f32 %v1035_v46, 0.0 }
 0x190   :  { %v1056_v20 = vmax.f32 %v1038_v18, 0.0  ;;  %v1257_v18 = vld [vmem:[%s2135_s5] sm:$0x1] }
 0x192   :  { %v1064_v21 = vpack.c.bf16 %v1056_v20, %v1055_v19  ;;  %v1264_v19 = vlaneseq }
 0x194   :  { %1677 = vmatmul.mubr.bf16.gmra.mrb[60].mxu1 %v1064_v21  ;;  %v1265_v20 = vshrl.u32 %v1264_v19, 7 }
 0x196   :  { %v1266_v21 = vsub.s32 0, %v1265_v20 }
 0x1f4   :  { %v1262_v24 = vpop.permute.xlu0 %1261 }
 0x1f5   :  { %v1267_v25 = vrot.slane %v1262_v24, %v1266_v21 }
 0x237   :  { %v1666_v27 = vpop.f32.mrb[48].mxu1 }
 0x238   :  { %v1179_v52 = vadd.f32 %v1666_v27, %v1422_v26  ;;  %v1170_v28 = vpop.f32.mrb[49].mxu1 }
 0x239   :  { %v1171_v29 = vadd.f32 %v1422_v26, %v1170_v28  ;;  %v1667_v30 = vpop.f32.mrb[50].mxu1 }
 0x23a   :  { %v1182_v31 = vadd.f32 %v1667_v30, %v1422_v26  ;;  %v1173_v32 = vpop.f32.mrb[51].mxu1  ;;  %v1235_v5 = vmax.f32 %v1179_v52, 0.0 }
 0x23b   :  { %v1174_v33 = vadd.f32 %v1422_v26, %v1173_v32  ;;  %v1233_v35 = vmax.f32 %v1171_v29, 0.0 }
 0x23c   :  { %v1236_v34 = vmax.f32 %v1182_v31, 0.0 }
 0x23d   :  { %v1234_v36 = vmax.f32 %v1174_v33, 0.0 }
 0x23e   :  { %v1250_v37 = vpack.c.bf16 %v1236_v34, %v1235_v5 }
 0x23f   :  { %v1249_v38 = vpack.c.bf16 %v1234_v36, %v1233_v35 }
 0x241   :  { %1681 = vmatpush3.bf16.xpose.msra.mxu0 %v1249_v38 }
 0x242   :  { %1682 = vmatprep.subr.bf16.mxu0 %v1957_v22 }
 0x247   :  { %v1670_v58 = vpop.f32.mrb[52].mxu1 }
 0x248   :  { %v1195_v39 = vadd.f32 %v1670_v58, %v1422_v26  ;;  %v1186_v40 = vpop.f32.mrb[53].mxu1 }
 0x249   :  { %v1187_v11 = vadd.f32 %v1422_v26, %v1186_v40  ;;  %v1671_v41 = vpop.f32.mrb[54].mxu1  ;;  %1683 = vmatpush3.bf16.xpose.msra.mxu0 %v1250_v37 }
 0x24a   :  { %v1198_v42 = vadd.f32 %v1671_v41, %v1422_v26  ;;  %v1189_v43 = vpop.f32.mrb[55].mxu1  ;;  %1684 = vmatprep.subr.bf16.mxu0 %v1957_v22  ;;  %v1239_v0 = vmax.f32 %v1195_v39, 0.0 }
 0x24b   :  { %v1190_v44 = vadd.f32 %v1422_v26, %v1189_v43  ;;  %v1237_v48 = vmax.f32 %v1187_v11, 0.0 }
 0x24c   :  { %v1240_v47 = vmax.f32 %v1198_v42, 0.0 }
 0x24d   :  { %v1238_v49 = vmax.f32 %v1190_v44, 0.0 }
 0x24e   :  { %v1252_v45 = vpack.c.bf16 %v1240_v47, %v1239_v0 }
 0x24f   :  { %v1251_v50 = vpack.c.bf16 %v1238_v49, %v1237_v48 }
 0x251   :  { %1685 = vmatpush3.bf16.xpose.msra.mxu0 %v1251_v50 }
 0x252   :  { %1686 = vmatprep.subr.bf16.mxu0 %v1957_v22 }
 0x257   :  { %v1674_v53 = vpop.f32.mrb[56].mxu1 }
 0x258   :  { %v1211_v54 = vadd.f32 %v1674_v53, %v1422_v26  ;;  %v1202_v55 = vpop.f32.mrb[57].mxu1 }
 0x259   :  { %v1203_v17 = vadd.f32 %v1422_v26, %v1202_v55  ;;  %v1675_v56 = vpop.f32.mrb[58].mxu1  ;;  %1687 = vmatpush3.bf16.xpose.msra.mxu0 %v1252_v45 }
 0x25a   :  { %v1214_v59 = vadd.f32 %v1675_v56, %v1422_v26  ;;  %v1205_v51 = vpop.f32.mrb[59].mxu1  ;;  %1688 = vmatprep.subr.bf16.mxu0 %v1957_v22  ;;  %v1243_v60 = vmax.f32 %v1211_v54, 0.0 }
 0x25b   :  { %v1206_v6 = vadd.f32 %v1422_v26, %v1205_v51  ;;  %v1241_v62 = vmax.f32 %v1203_v17, 0.0 }
 0x25c   :  { %v1244_v61 = vmax.f32 %v1214_v59, 0.0 }
 0x25d   :  { %v1242_v1 = vmax.f32 %v1206_v6, 0.0 }
 0x25e   :  { %v1254_v23 = vpack.c.bf16 %v1244_v61, %v1243_v60 }
 0x25f   :  { %v1253_v2 = vpack.c.bf16 %v1242_v1, %v1241_v62 }
 0x261   :  { %1689 = vmatpush3.bf16.xpose.msra.mxu0 %v1253_v2 }
 0x262   :  { %1690 = vmatprep.subr.bf16.mxu0 %v1957_v22 }
 0x267   :  { %v1678_v3 = vpop.f32.mrb[60].mxu1 }
 0x268   :  { %v1227_v12 = vadd.f32 %v1678_v3, %v1422_v26  ;;  %v1218_v4 = vpop.f32.mrb[61].mxu1 }
 0x269   :  { %v1219_v7 = vadd.f32 %v1422_v26, %v1218_v4  ;;  %v1679_v57 = vpop.f32.mrb[62].mxu1  ;;  %1691 = vmatpush3.bf16.xpose.msra.mxu0 %v1254_v23 }
 0x26a   :  { %v1230_v8 = vadd.f32 %v1679_v57, %v1422_v26  ;;  %v1221_v9 = vpop.f32.mrb[63].mxu1  ;;  %1692 = vmatprep.subr.bf16.mxu0 %v1957_v22  ;;  %v1247_v13 = vmax.f32 %v1227_v12, 0.0 }
 0x26b   :  { %v1222_v10 = vadd.f32 %v1422_v26, %v1221_v9  ;;  %v1245_v15 = vmax.f32 %v1219_v7, 0.0 }
 0x26c   :  { %v1248_v14 = vmax.f32 %v1230_v8, 0.0 }
 0x26d   :  { %v1246_v16 = vmax.f32 %v1222_v10, 0.0 }
 0x26e   :  { %v1256_v46 = vpack.c.bf16 %v1248_v14, %v1247_v13 }
 0x26f   :  { %v1255_v63 = vpack.c.bf16 %v1246_v16, %v1245_v15 }
 0x271   :  { %1693 = vmatpush3.bf16.xpose.msra.mxu0 %v1255_v63 }
 0x272   :  { %1694 = vmatprep.subr.bf16.mxu0 %v1957_v22 }
 0x279   :  { %1695 = vmatpush3.bf16.xpose.msra.mxu0 %v1256_v46 }
 0x280   :  { %1697 = vmatmul.mubr.bf16.vlgmr.msra.gmra.mrb[48].mxu0 %v1257_v18 }
 0x353   :  { %v1302_v26 = vpop.f32.mrb[48].mxu0 }
 0x354   :  { %v1303_v27 = vadd.f32 %v1302_v26, %v1267_v25  ;;  %v1698_v52 = vpop.f32.mrb[49].mxu0 }
 0x355   :  { %v1305_v28 = vpop.f32.mrb[50].mxu0 }
 0x356   :  { %1308 = vst [vmem:[#allocation9] sm:$0x1] %v1303_v27  ;;  %v1699_v22 = vpop.f32.mrb[51].mxu0 }
 0x357   :  { %1933 = shalt.err (!%p1930_p0)
}
 0x358   :  { %s1934_s24 = scalar_lea.hbm %s2137_s7, 16 }
 0x359   :  { %p1935_p1 = scmp.ne.s32.totalorder %s2137_s7, %s1934_s24  ;;  %p1938_p2 = scmp.lt.u32.totalorder %s1934_s24, %s2137_s7 }
 0x35b   :  { %p1940_p3 = pnand %p1938_p2, %p1935_p1 }
 0x35d   :  { %1943 = shalt.err (!%p1940_p3)
}
 0x35e   :  { %1318 = dma.vmem_to_hbm [thread:$0]  %s1316_s20, 16, %s2137_s7, [#allocation5]  }
 0x35f   :  { %1948 = dma.done.wait [#allocation5], 16  }
 0x360   :  { %1949 = vsyncadd [#allocation5], 4294967280 }
 0x361   :  { %1322 = vsyncpa [#allocation4], 1 }
 0x362   :  { %1323 = vsyncpa [#allocation7], 1 }
 0x363   :  { %1324 = vsyncpa [#allocation5], 1 }

</bundles_post_ra>
